<compile_context>
chip_gen: v5e
topology: v5e:2x2
jax: 0.10.0
libtpu: 0.0.40
codegen_flags: <defaults>
</compile_context>

<pallas_src>
import jax
import jax.numpy as jnp
from jax.experimental import pallas as pl
from jax.experimental.pallas import tpu as pltpu


def build_fixed_positional_encoding_table(embedding_dim: int,
                                          max_length: int = 5000,
                                          dtype=jnp.float32) -> jnp.ndarray:
    """Replicates the PyTorch __init__ exactly. Returns (max_length, 1, D).

    Build it once per model (in the activation dtype) so the forward pass does
    no per-call slice/convert work.
    """
    position = jnp.arange(0, max_length, dtype=jnp.float32)[:, None]          # (L, 1)
    div_term = jnp.exp(
        jnp.arange(0, embedding_dim, 2, dtype=jnp.float32)
        * (-jnp.log(jnp.float32(10000.0)) / embedding_dim)
    )                                                                          # (D/2,)
    pe = jnp.zeros((max_length, embedding_dim), dtype=jnp.float32)
    pe = pe.at[:, 0::2].set(jnp.sin(position * div_term))
    pe = pe.at[:, 1::2].set(jnp.cos(position * div_term))
    # unsqueeze(0).transpose(0, 1) -> (max_length, 1, embedding_dim)
    return pe[:, None, :].astype(dtype)


def _add_pe_kernel(x_ref, pe_ref, o_ref):
    # x_ref / o_ref: (tS, B, D);  pe_ref: (tS, 1, D).
    # The size-1 second-minor (sublane) dim of pe broadcasts implicitly in the
    # add -- no materialized (tS, B, D) pe intermediate, no reshape.
    o_ref[...] = x_ref[...] + pe_ref[...]


def _bytes_per_seq_row(B: int, D: int, itemsize: int) -> int:
    # Double-buffered working set per sequence row:
    #   2 bufs * (x block + out block)            = 4 * B * D * itemsize
    #   2 bufs * pe block, sublane-padded         = 2 * 32 * D
    # (a (1, D) row pads to one full (8,128)-style tile: 32 bytes per lane
    #  regardless of dtype packing).
    return 4 * B * D * itemsize + 64 * D


def _choose_seq_tile(S: int, B: int, D: int, itemsize: int,
                     vmem_budget_bytes: int) -> int:
    """Pick a sequence tile tS; returns 0 if even a 1-row tile busts the budget."""
    row_bytes = _bytes_per_seq_row(B, D, itemsize)
    tS_max = vmem_budget_bytes // row_bytes
    if tS_max < 1:
        return 0  # caller falls back to the plain XLA broadcast-add
    if tS_max >= S:
        if S < 16:
            return S  # too small to bother splitting
        steps = 2     # >=2 near-equal steps so both v7x TensorCores get work
    else:
        steps = pl.cdiv(S, tS_max)
        # Even number of near-equal steps -> balanced megacore split on v7x
        # (no effect on v5e/v6e, which have a single TensorCore).
        if steps % 2 == 1:
            steps += 1
    return int(pl.cdiv(S, steps))


def fixed_positional_encoding(x: jnp.ndarray, pe: jnp.ndarray, *,
                              min_pallas_bytes: int = 512 * 1024,
                              vmem_budget_bytes: int = 28 * 1024 * 1024) -> jnp.ndarray:
    """Forward pass: x + pe[:x.shape[0]].   x: (S, B, D),  pe: (max_length, 1, D)."""
    S, B, D = x.shape
    if pe.ndim != 3 or pe.shape[1] != 1 or pe.shape[2] != D:
        raise ValueError(f"pe must be (max_length, 1, {D}), got {pe.shape}")
    max_length = pe.shape[0]
    if S > max_length:
        raise ValueError(f"sequence length {S} exceeds pe max_length {max_length}")

    itemsize = jnp.dtype(x.dtype).itemsize

    # Tiny tensors: launch/DMA overhead dominates -> let XLA fuse the add.
    if x.size * itemsize < min_pallas_bytes:
        return x + pe[:S].astype(x.dtype)

    tS = _choose_seq_tile(S, B, D, itemsize, vmem_budget_bytes)
    if tS == 0:
        # Even a single-row tile exceeds the VMEM budget (huge B*D): fall back.
        return x + pe[:S].astype(x.dtype)

    grid = (pl.cdiv(S, tS),)

    # Dtype-matched pe. If the table was pre-built in x.dtype (recommended),
    # this is a no-op and the full table is passed straight through -- the
    # BlockSpec index_map only ever DMAs the first ceil(S/tS) tiles of it.
    pe_in = pe if pe.dtype == x.dtype else pe[:S].astype(x.dtype)

    # Explicit scoped-VMEM limit: measured working set + headroom for Mosaic
    # internal scratch. With the default budget this stays <= ~32 MiB, which
    # fits v5e/v6e (128 MiB physical) and v7x (64 MiB physical, 32 MiB default).
    working_set = _bytes_per_seq_row(B, D, itemsize) * tS
    vmem_limit = int(working_set + (4 << 20))

    cost = pl.CostEstimate(
        flops=S * B * D,
        transcendentals=0,
        bytes_accessed=(2 * S * B + S) * D * itemsize,
    )

    out = pl.pallas_call(
        _add_pe_kernel,
        out_shape=jax.ShapeDtypeStruct((S, B, D), x.dtype),
        grid=grid,
        in_specs=[
            pl.BlockSpec((tS, B, D), lambda i: (i, 0, 0)),
            pl.BlockSpec((tS, 1, D), lambda i: (i, 0, 0)),
        ],
        out_specs=pl.BlockSpec((tS, B, D), lambda i: (i, 0, 0)),
        input_output_aliases={0: 0},  # out aliases x (donate x at jit for the win)
        compiler_params=pltpu.CompilerParams(
            dimension_semantics=("parallel",),
            vmem_limit_bytes=vmem_limit,
        ),
        cost_estimate=cost,
    )(x, pe_in)

    return out


if __name__ == "__main__":
    k1, k2, k3 = jax.random.split(jax.random.PRNGKey(0), 3)

    # --- Case 1: Pallas path, TPU-friendly shape ---------------------------
    S1, B1, D1 = 64, 8, 128
    x1 = jax.random.normal(k1, (S1, B1, D1), dtype=jnp.float32)
    pe1 = build_fixed_positional_encoding_table(D1, max_length=256, dtype=jnp.float32)
    ref1 = x1 + pe1[:S1]                               # reference BEFORE aliased call
    out1 = fixed_positional_encoding(x1, pe1, min_pallas_bytes=0)  # force kernel path
    out1 = jax.block_until_ready(out1)
    assert out1.shape == x1.shape
    assert jnp.allclose(out1, ref1, atol=1e-6), "Pallas path mismatch"

    # --- Case 2: ragged last block (S not divisible by the chosen tile) ----
    S2, B2, D2 = 70, 8, 128
    x2 = jax.random.normal(k2, (S2, B2, D2), dtype=jnp.float32)
    ref2 = x2 + pe1[:S2]
    # Small budget forces tS=18 -> grid of 4 blocks (18,18,18,16): exercises
    # the partial last block and the even-grid megacore balancing.
    out2 = fixed_positional_encoding(x2, pe1, min_pallas_bytes=0,
                                     vmem_budget_bytes=512 * 1024)
    out2 = jax.block_until_ready(out2)
    assert jnp.allclose(out2, ref2, atol=1e-6), "ragged Pallas path mismatch"

    # --- Case 3: tiny demo shape -> small-problem fast path ----------------
    S3, B3, D3 = 8, 2, 32
    x3 = jax.random.normal(k3, (S3, B3, D3), dtype=jnp.float32)
    pe3 = build_fixed_positional_encoding_table(D3, max_length=64, dtype=jnp.float32)
    ref3 = x3 + pe3[:S3]
    out3 = fixed_positional_encoding(x3, pe3)          # below threshold -> plain add
    out3 = jax.block_until_ready(out3)
    assert jnp.allclose(out3, ref3, atol=1e-6), "fast path mismatch"

    print("KERNEL_OK")
</pallas_src>

<mosaic_0001>
module attributes {stable_mosaic.version = 11 : i64} {
  func.func @_add_pe_kernel(%arg0: i32, %arg1: memref<32x8x128xf32, #tpu.memory_space<vmem>>, %arg2: memref<32x1x128xf32, #tpu.memory_space<vmem>>, %arg3: memref<32x8x128xf32, #tpu.memory_space<vmem>>) attributes {dimension_semantics = [#tpu.dimension_semantics<parallel>], iteration_bounds = array<i64: 2>, scalar_prefetch = 0 : i64, scratch_operands = 0 : i64, tpu.core_type = #tpu.core_type<tc>, window_params = [{transform_indices = @transform_0, window_bounds = array<i64: 32, 8, 128>}, {transform_indices = @transform_1, window_bounds = array<i64: 32, 1, 128>}, {transform_indices = @transform_2, window_bounds = array<i64: 32, 8, 128>}]} {
    %c0 = arith.constant 0 : index
    %c0_0 = arith.constant 0 : index
    %c0_1 = arith.constant 0 : index
    %0 = vector.load %arg1[%c0, %c0_0, %c0_1] : memref<32x8x128xf32, #tpu.memory_space<vmem>>, vector<32x8x128xf32>
    %c0_2 = arith.constant 0 : index
    %c0_3 = arith.constant 0 : index
    %c0_4 = arith.constant 0 : index
    %1 = vector.load %arg2[%c0_2, %c0_3, %c0_4] : memref<32x1x128xf32, #tpu.memory_space<vmem>>, vector<32x1x128xf32>
    %2 = vector.broadcast %1 : vector<32x1x128xf32> to vector<32x8x128xf32>
    %3 = arith.addf %0, %2 : vector<32x8x128xf32>
    %c0_5 = arith.constant 0 : index
    %c0_6 = arith.constant 0 : index
    %c0_7 = arith.constant 0 : index
    %4 = vector.load %arg3[%c0_5, %c0_6, %c0_7] : memref<32x8x128xf32, #tpu.memory_space<vmem>>, vector<32x8x128xf32>
    tpu.vector_store %arg3[%c0_5, %c0_6, %c0_7], %3 {strides = array<i32>} : memref<32x8x128xf32, #tpu.memory_space<vmem>>, vector<32x8x128xf32>,
    return
  }
  func.func @transform_0(%arg0: i32) -> (i32, i32, i32) {
    %c0_i32 = arith.constant 0 : i32
    %c0_i32_0 = arith.constant 0 : i32
    %c0_i32_1 = arith.constant 0 : i32
    return %arg0, %c0_i32, %c0_i32_0 : i32, i32, i32
  }
  func.func @transform_1(%arg0: i32) -> (i32, i32, i32) {
    %c0_i32 = arith.constant 0 : i32
    %c0_i32_0 = arith.constant 0 : i32
    %c0_i32_1 = arith.constant 0 : i32
    return %arg0, %c0_i32, %c0_i32_0 : i32, i32, i32
  }
  func.func @transform_2(%arg0: i32) -> (i32, i32, i32) {
    %c0_i32 = arith.constant 0 : i32
    %c0_i32_0 = arith.constant 0 : i32
    %c0_i32_1 = arith.constant 0 : i32
    return %arg0, %c0_i32, %c0_i32_0 : i32, i32, i32
  }
}

</mosaic_0001>

<bundles_post_ra>
// kernel: tpu_custom_call.1
= control target key start
LH: loop header
LB: loop body
LE: loop exit
PB: predicated region body
PF: predicated region fallthrough
CT: control target
= control target key end

     0   :  { %7 = vsyncpa [#allocation3], 0  ;;  %s964_s0 = inlined_call_operand.hbm [shape: f32[64,8,128], index: 0, kind: input, shape index: {}, may-alias: {0,2}]   ;;  %s965_s1 = inlined_call_operand.vmem [shape: f32[256,1,128], index: 1, kind: input, shape index: {}]   ;;  %s966_s2 = inlined_call_operand.hbm [shape: f32[64,8,128], index: 2, kind: output, shape index: {}, may-alias: {0,2}]  }
   0x1   :  { %9 = vsyncpa [#allocation3 + $0x1], 0 }
   0x2   :  { %10 = vsyncpa [#allocation4], 0 }
   0x3   :  { %12 = vsyncpa [#allocation4 + $0x1], 0  ;;  %s723_s9 = smov 0   ;;  %s725_s10 = smov 0  }
   0x4   :  { %s727_s11 = smov 0   ;;  %s729_s12 = smov 0  }
   0x5 LB: > { %s744_s13 = sadd.s32 4294967295, %s702_s12   ;;  %s507_s14 = sadd.s32 4294967294, %s702_s12   ;;  %s702_s12 = sphi %s729_s12, %s976_s12   ;;  %s698_s11 = sphi %s727_s11, %s975_s11   ;;  %s694_s10 = sphi %s725_s10, %s974_s10   ;;  %s690_s9 = sphi %s723_s9, %s973_s9  }
   0x6   : > { %s748_s15 = sadd.s32 1, %s702_s12   ;;  %s25_s16 = sadd.s32 1, %s698_s11 }
   0x7   : > { %s22_s17 = ssub.s32 %s702_s12, %s748_s15  ;;  %p32_p0 = scmp.ne.s32.totalorder %s698_s11, %s694_s10 }
   0x8   : > { %p23_p1 = scmp.eq.s32.totalorder %s22_s17, 0  ;;  %p33_p2 = scmp.eq.s32.totalorder %s702_s12, 0 }
   0x9   : > { %p38_p3 = scmp.ne.s32.totalorder %s694_s10, %s690_s9  ;;  %p39_p4 = scmp.eq.s32.totalorder %s744_s13, 0 }
   0xa   : > { %s760_s18 = scalar_select %p23_p1, %s698_s11, %s25_s16  }
   0xb   : > { %p762_p5 = por %p33_p2, %p32_p0  ;;  %p766_p6 = por %p39_p4, %p38_p3 }
   0xc   : > { %p88_p7 = scmp.eq.s32.totalorder %s744_s13, 1  ;;  %p94_p8 = scmp.eq.s32.totalorder %s507_s14, 1 }
   0xd   : > { %p536_p10 = scmp.lt.s32.totalorder %s702_s12, 2  ;;  %s114_s23 = sand.u32 1, %s698_s11  }
   0xe   : > { %p773_p11 = por %p88_p7, %p32_p0  ;;  %p777_p12 = por %p94_p8, %p38_p3 }
   0xf   : > { %s522_s24 = sshll.u32 %s702_s12, 8  ;;  %s510_s25 = sshll.u32 %s114_s23, 8 }
  0x10   : > { %s123_s28 = scalar_lea.hbm %s964_s0, %s522_s24  ;;  %s118_s30 = scalar_lea.vmem [#allocation2], %s510_s25 }
  0x11   : > { %s124_s29 = sshll.u32 %s123_s28, 4  ;;  %s126_s3 = sshll.u32 %s118_s30, 4  ;;  %s125_s29 = int_to_ptr.hbm [resolvable:$true] %s124_s29  ;;  %s127_s3 = int_to_ptr.vmem [resolvable:$true] %s126_s3 }
  0x12   : > { %p788_p13 = pnand %p536_p10, %p762_p5  ;;  %p513_p0 = scmp.ge.s32.totalorder %s702_s12, 1 }
  0x13   : > { %p142_p1 = scmp.lt.s32.totalorder %s702_s12, 3  ;;  %s115_s5 = scalar_lea.sflag [#allocation3], %s114_s23 }
  0x14   : > { %s606_s6 = sshra.s32 %s125_s29, 4  ;;  %p610_p3 = pneg %p788_p13  ;;  %s607_s6 = int_to_ptr.hbm [resolvable:$true] %s606_s6 }
  0x15   : > { %s608_s7 = scalar_lea.hbm %s607_s6, 256  ;;  %s613_s16 = scalar_lea.hbm %s964_s0, 512 }
  0x16   : > { %p609_p2 = scmp.ne.s32.totalorder %s607_s6, %s608_s7  ;;  %p614_p5 = scmp.lt.s32.totalorder %s607_s6, %s964_s0 }
  0x17   : > { %p615_p8 = scmp.lt.s32.totalorder %s613_s16, %s608_s7 }
  0x18   : > { %p611_p4 = pnand %p610_p3, %p609_p2 }
  0x19   : > { %p616_p10 = por %p615_p8, %p614_p5 }
  0x1a   : > { %p612_p7 = pneg %p611_p4 }
  0x1c   : > { %p617_p9 = pnand %p616_p10, %p612_p7 }
  0x1e   : > { %620 = shalt.err (!%p617_p9)
}
  0x1f   : > { %s704_s23 = smov 128   ;;  %s705_s24 = smov 8  }
  0x20   : > { %531 = dma.hbm_to_vmem [thread:$0]  (!%p788_p13), %s125_s29, 4096, %s127_s3, %s115_s5, %s704_s23, %s704_s23, %s705_s24  }
  0x21   : > { %p143_p2 = pnand %p513_p0, %p142_p1 }
  0x22   : > { %s809_s25 = sand.u32 (!%p143_p2), 1, %s694_s10  }
  0x23   : > { %146 = sbr.rel (%p143_p2) target bundleno = 84 (0x54), region = 28  ;;  %s514_s26 = sshll.u32 (!%p143_p2), %s809_s25, 8 }
  0x24   : > { %s149_s27 = scalar_lea.sflag (!%p143_p2), [#allocation3], %s809_s25  ;;  %s813_s28 = scalar_lea.vmem (!%p143_p2), [#allocation2], %s514_s26 }
  0x28   : > { %681 = dma.done.wait (%p766_p6), %s149_s27, 4096  }
  0x29   : > { %683 = vsyncadd (%p766_p6), %s149_s27, 4294963200  ;;  %s516_s29 = sshll.u32 %s744_s13, 5  ;;  %s523_s20 = sshll.u32 %s744_s13, 8  ;;  %v185_v0 = vld [vmem:[%s813_s28] sm:$0xff]  ;;  %v186_v2 = vld [vmem:[%s813_s28 + $0x8] sm:$0xff] }
  0x2a   : > { %p180_p9 = scmp.lt.s32.totalorder %s516_s29, 255  ;;  %s833_s7 = scalar_lea.hbm %s966_s2, %s523_s20  ;;  %v187_v5 = vld [vmem:[%s813_s28 + $0x10] sm:$0xff]  ;;  %v188_v8 = vld [vmem:[%s813_s28 + $0x18] sm:$0xff]  ;;  %v189_v11 = vld [vmem:[%s813_s28 + $0x20] sm:$0xff] }
  0x2b   : > { %s839_s13 = scalar_lea.vmem [#allocation5], %s514_s26  ;;  %s424_s14 = sshll.u32 %s833_s7, 4  ;;  %v190_v14 = vld [vmem:[%s813_s28 + $0x28] sm:$0xff]  ;;  %v191_v17 = vld [vmem:[%s813_s28 + $0x30] sm:$0xff]  ;;  %v192_v20 = vld [vmem:[%s813_s28 + $0x38] sm:$0xff]  ;;  %s425_s14 = int_to_ptr.hbm [resolvable:$true] %s424_s14 }
  0x2c   : > { %s978_s29 = smov (!%p180_p9, %s516_s29), 255  ;;  %s422_s8 = sshll.u32 %s839_s13, 4  ;;  %v193_v23 = vld [vmem:[%s813_s28 + $0x40] sm:$0xff]  ;;  %v194_v26 = vld [vmem:[%s813_s28 + $0x48] sm:$0xff]  ;;  %v195_v29 = vld [vmem:[%s813_s28 + $0x50] sm:$0xff]  ;;  %s423_s8 = int_to_ptr.vmem [resolvable:$true] %s422_s8 }
  0x2d   : > { %s823_s4 = scalar_lea.vmem %s965_s1, %s978_s29  ;;  %v196_v32 = vld [vmem:[%s813_s28 + $0x58] sm:$0xff]  ;;  %v197_v35 = vld [vmem:[%s813_s28 + $0x60] sm:$0xff]  ;;  %v198_v38 = vld [vmem:[%s813_s28 + $0x68] sm:$0xff]  ;;  %s410_s16 = scalar_lea.sflag [#allocation4], %s809_s25 }
  0x2e   : > { %v574_v1 = vld [vmem:[%s823_s4] ss:$0 sm:$0xff]  ;;  %v575_v3 = vld [vmem:[%s823_s4 + $0x1] ss:$0 sm:$0xff]  ;;  %v576_v6 = vld [vmem:[%s823_s4 + $0x2] ss:$0 sm:$0xff] }
  0x2f   : > { %v345_v4 = vadd.f32 %v574_v1, %v185_v0  ;;  %v346_v7 = vadd.f32 %v575_v3, %v186_v2  ;;  %v577_v9 = vld [vmem:[%s823_s4 + $0x3] ss:$0 sm:$0xff]  ;;  %v347_v10 = vadd.f32 %v576_v6, %v187_v5  ;;  %v578_v12 = vld [vmem:[%s823_s4 + $0x4] ss:$0 sm:$0xff]  ;;  %v579_v15 = vld [vmem:[%s823_s4 + $0x5] ss:$0 sm:$0xff] }
  0x30   : > { %v348_v13 = vadd.f32 %v577_v9, %v188_v8  ;;  %v349_v16 = vadd.f32 %v578_v12, %v189_v11  ;;  %v580_v18 = vld [vmem:[%s823_s4 + $0x6] ss:$0 sm:$0xff]  ;;  %v350_v19 = vadd.f32 %v579_v15, %v190_v14  ;;  %v581_v21 = vld [vmem:[%s823_s4 + $0x7] ss:$0 sm:$0xff]  ;;  %v582_v24 = vld [vmem:[%s823_s4 + $0x8] ss:$0 sm:$0xff] }
  0x31   : > { %377 = vst [vmem:[%s839_s13] sm:$0xff] %v345_v4  ;;  %v351_v22 = vadd.f32 %v580_v18, %v191_v17  ;;  %v352_v25 = vadd.f32 %v581_v21, %v192_v20  ;;  %v583_v27 = vld [vmem:[%s823_s4 + $0x9] ss:$0 sm:$0xff]  ;;  %v353_v28 = vadd.f32 %v582_v24, %v193_v23  ;;  %v584_v30 = vld [vmem:[%s823_s4 + $0xa] ss:$0 sm:$0xff]  ;;  %v585_v33 = vld [vmem:[%s823_s4 + $0xb] ss:$0 sm:$0xff] }
  0x32   : > { %378 = vst [vmem:[%s839_s13 + $0x8] sm:$0xff] %v346_v7  ;;  %v354_v31 = vadd.f32 %v583_v27, %v194_v26  ;;  %v355_v34 = vadd.f32 %v584_v30, %v195_v29  ;;  %v586_v36 = vld [vmem:[%s823_s4 + $0xc] ss:$0 sm:$0xff]  ;;  %v356_v37 = vadd.f32 %v585_v33, %v196_v32  ;;  %v587_v39 = vld [vmem:[%s823_s4 + $0xd] ss:$0 sm:$0xff]  ;;  %v199_v41 = vld [vmem:[%s813_s28 + $0x70] sm:$0xff] }
  0x33   : > { %379 = vst [vmem:[%s839_s13 + $0x10] sm:$0xff] %v347_v10  ;;  %v357_v40 = vadd.f32 %v586_v36, %v197_v35  ;;  %v588_v42 = vld [vmem:[%s823_s4 + $0xe] ss:$0 sm:$0xff]  ;;  %v358_v43 = vadd.f32 %v587_v39, %v198_v38  ;;  %v200_v44 = vld [vmem:[%s813_s28 + $0x78] sm:$0xff]  ;;  %v589_v45 = vld [vmem:[%s823_s4 + $0xf] ss:$0 sm:$0xff] }
  0x34   : > { %380 = vst [vmem:[%s839_s13 + $0x18] sm:$0xff] %v348_v13  ;;  %v359_v46 = vadd.f32 %v588_v42, %v199_v41  ;;  %v201_v47 = vld [vmem:[%s813_s28 + $0x80] sm:$0xff]  ;;  %v590_v48 = vld [vmem:[%s823_s4 + $0x10] ss:$0 sm:$0xff]  ;;  %v360_v49 = vadd.f32 %v589_v45, %v200_v44  ;;  %v202_v50 = vld [vmem:[%s813_s28 + $0x88] sm:$0xff]  ;;  %s650_s17 = sshra.s32 %s425_s14, 4  ;;  %s651_s17 = int_to_ptr.hbm [resolvable:$true] %s650_s17 }
  0x35   : > { %381 = vst [vmem:[%s839_s13 + $0x20] sm:$0xff] %v349_v16  ;;  %v591_v51 = vld [vmem:[%s823_s4 + $0x11] ss:$0 sm:$0xff]  ;;  %v361_v52 = vadd.f32 %v590_v48, %v201_v47  ;;  %v592_v54 = vld [vmem:[%s823_s4 + $0x12] ss:$0 sm:$0xff]  ;;  %v204_v56 = vld [vmem:[%s813_s28 + $0x98] sm:$0xff]  ;;  %p657_p1 = scmp.lt.s32.totalorder %s651_s17, %s966_s2 }
  0x36   : > { %382 = vst [vmem:[%s839_s13 + $0x28] sm:$0xff] %v350_v19  ;;  %v203_v53 = vld [vmem:[%s813_s28 + $0x90] sm:$0xff]  ;;  %v362_v55 = vadd.f32 %v591_v51, %v202_v50  ;;  %v205_v59 = vld [vmem:[%s813_s28 + $0xa0] sm:$0xff]  ;;  %v206_v62 = vld [vmem:[%s813_s28 + $0xa8] sm:$0xff]  ;;  %s652_s19 = scalar_lea.hbm %s651_s17, 256  ;;  %s656_s26 = scalar_lea.hbm %s966_s2, 512 }
  0x37   : > { %383 = vst [vmem:[%s839_s13 + $0x30] sm:$0xff] %v351_v22  ;;  %v593_v57 = vld [vmem:[%s823_s4 + $0x13] ss:$0 sm:$0xff]  ;;  %v363_v58 = vadd.f32 %v592_v54, %v203_v53  ;;  %v594_v60 = vld [vmem:[%s823_s4 + $0x14] ss:$0 sm:$0xff]  ;;  %v208_v4 = vld [vmem:[%s813_s28 + $0xb8] sm:$0xff]  ;;  %p653_p6 = scmp.ne.s32.totalorder %s651_s17, %s652_s19  ;;  %p658_p3 = scmp.lt.s32.totalorder %s656_s26, %s652_s19 }
  0x38   : > { %384 = vst [vmem:[%s839_s13 + $0x38] sm:$0xff] %v352_v25  ;;  %v364_v61 = vadd.f32 %v593_v57, %v204_v56  ;;  %v595_v63 = vld [vmem:[%s823_s4 + $0x15] ss:$0 sm:$0xff]  ;;  %v365_v0 = vadd.f32 %v594_v60, %v205_v59  ;;  %v596_v2 = vld [vmem:[%s823_s4 + $0x16] ss:$0 sm:$0xff]  ;;  %v209_v7 = vld [vmem:[%s813_s28 + $0xc0] sm:$0xff] }
  0x39   : > { %385 = vst [vmem:[%s839_s13 + $0x40] sm:$0xff] %v353_v28  ;;  %v207_v1 = vld [vmem:[%s813_s28 + $0xb0] sm:$0xff]  ;;  %v366_v3 = vadd.f32 %v595_v63, %v206_v62  ;;  %v598_v8 = vld [vmem:[%s823_s4 + $0x18] ss:$0 sm:$0xff]  ;;  %v210_v10 = vld [vmem:[%s813_s28 + $0xc8] sm:$0xff]  ;;  %p654_p13 = pnand %p653_p6, %p773_p11  ;;  %p659_p4 = por %p658_p3, %p657_p1 }
  0x3a   : > { %386 = vst [vmem:[%s839_s13 + $0x48] sm:$0xff] %v354_v31  ;;  %v597_v5 = vld [vmem:[%s823_s4 + $0x17] ss:$0 sm:$0xff]  ;;  %v367_v6 = vadd.f32 %v596_v2, %v207_v1  ;;  %v599_v11 = vld [vmem:[%s823_s4 + $0x19] ss:$0 sm:$0xff]  ;;  %v369_v12 = vadd.f32 %v598_v8, %v209_v7  ;;  %v213_v19 = vld [vmem:[%s813_s28 + $0xe0] sm:$0xff] }
  0x3b   : > { %387 = vst [vmem:[%s839_s13 + $0x50] sm:$0xff] %v355_v34  ;;  %v368_v9 = vadd.f32 %v597_v5, %v208_v4  ;;  %v211_v13 = vld [vmem:[%s813_s28 + $0xd0] sm:$0xff]  ;;  %v600_v14 = vld [vmem:[%s823_s4 + $0x1a] ss:$0 sm:$0xff]  ;;  %v370_v15 = vadd.f32 %v599_v11, %v210_v10  ;;  %v601_v17 = vld [vmem:[%s823_s4 + $0x1b] ss:$0 sm:$0xff]  ;;  %p655_p0 = pneg %p654_p13 }
  0x3c   : > { %388 = vst [vmem:[%s839_s13 + $0x58] sm:$0xff] %v356_v37  ;;  %v212_v16 = vld [vmem:[%s813_s28 + $0xd8] sm:$0xff]  ;;  %v371_v18 = vadd.f32 %v600_v14, %v211_v13  ;;  %v214_v22 = vld [vmem:[%s813_s28 + $0xe8] sm:$0xff]  ;;  %v215_v25 = vld [vmem:[%s813_s28 + $0xf0] sm:$0xff] }
  0x3d   : > { %389 = vst [vmem:[%s839_s13 + $0x60] sm:$0xff] %v357_v40  ;;  %v602_v20 = vld [vmem:[%s823_s4 + $0x1c] ss:$0 sm:$0xff]  ;;  %v372_v21 = vadd.f32 %v601_v17, %v212_v16  ;;  %v603_v23 = vld [vmem:[%s823_s4 + $0x1d] ss:$0 sm:$0xff]  ;;  %p660_p7 = pnand %p659_p4, %p655_p0 }
  0x3e   : > { %390 = vst [vmem:[%s839_s13 + $0x68] sm:$0xff] %v358_v43  ;;  %v373_v24 = vadd.f32 %v602_v20, %v213_v19  ;;  %v604_v26 = vld [vmem:[%s823_s4 + $0x1e] ss:$0 sm:$0xff]  ;;  %v374_v27 = vadd.f32 %v603_v23, %v214_v22  ;;  %v605_v29 = vld [vmem:[%s823_s4 + $0x1f] ss:$0 sm:$0xff] }
  0x3f   : > { %391 = vst [vmem:[%s839_s13 + $0x70] sm:$0xff] %v359_v46  ;;  %v216_v28 = vld [vmem:[%s813_s28 + $0xf8] sm:$0xff]  ;;  %v375_v30 = vadd.f32 %v604_v26, %v215_v25 }
  0x40   : > { %392 = vst [vmem:[%s839_s13 + $0x78] sm:$0xff] %v360_v49  ;;  %v376_v31 = vadd.f32 %v605_v29, %v216_v28 }
  0x41   : > { %393 = vst [vmem:[%s839_s13 + $0x80] sm:$0xff] %v361_v52 }
  0x42   : > { %394 = vst [vmem:[%s839_s13 + $0x88] sm:$0xff] %v362_v55 }
  0x43   : > { %395 = vst [vmem:[%s839_s13 + $0x90] sm:$0xff] %v363_v58 }
  0x44   : > { %396 = vst [vmem:[%s839_s13 + $0x98] sm:$0xff] %v364_v61 }
  0x45   : > { %397 = vst [vmem:[%s839_s13 + $0xa0] sm:$0xff] %v365_v0 }
  0x46   : > { %398 = vst [vmem:[%s839_s13 + $0xa8] sm:$0xff] %v366_v3 }
  0x47   : > { %399 = vst [vmem:[%s839_s13 + $0xb0] sm:$0xff] %v367_v6 }
  0x48   : > { %400 = vst [vmem:[%s839_s13 + $0xb8] sm:$0xff] %v368_v9 }
  0x49   : > { %401 = vst [vmem:[%s839_s13 + $0xc0] sm:$0xff] %v369_v12 }
  0x4a   : > { %402 = vst [vmem:[%s839_s13 + $0xc8] sm:$0xff] %v370_v15 }
  0x4b   : > { %403 = vst [vmem:[%s839_s13 + $0xd0] sm:$0xff] %v371_v18 }
  0x4c   : > { %404 = vst [vmem:[%s839_s13 + $0xd8] sm:$0xff] %v372_v21 }
  0x4d   : > { %405 = vst [vmem:[%s839_s13 + $0xe0] sm:$0xff] %v373_v24 }
  0x4e   : > { %406 = vst [vmem:[%s839_s13 + $0xe8] sm:$0xff] %v374_v27 }
  0x4f   : > { %407 = vst [vmem:[%s839_s13 + $0xf0] sm:$0xff] %v375_v30 }
  0x50   : > { %408 = vst [vmem:[%s839_s13 + $0xf8] sm:$0xff] %v376_v31 }
  0x51   : > { %663 = shalt.err (!%p660_p7)
}
  0x52   : > { %s706_s25 = smov 128   ;;  %s707_s29 = smov 8  }
  0x53   : > { %526 = dma.vmem_to_hbm [thread:$0]  (%p773_p11), %s423_s8, 4096, %s425_s14, %s410_s16, %s706_s25, %s706_s25, %s707_s29  }
  0x54 PF: > { %s439_s30 = sand.u32 1, %s690_s9   ;;  %p972_p5 = scmp.ge.s32.totalorder %s702_s12, 2 }
  0x55   : > { %s440_s3 = scalar_lea.sflag [#allocation4], %s439_s30 }
  0x56   : > { %p533_p8 = pnand %p972_p5, %p777_p12 }
  0x58   : > { %p534_p10 = pneg %p533_p8 }
  0x5a   : > { %685 = dma.done.wait (%p534_p10), %s440_s3, 4096  }
  0x5b   : > { %687 = vsyncadd (%p534_p10), %s440_s3, 4294963200  ;;  %p15_p2 = scmp.ge.s32.totalorder %s748_s15, 4   ;;  %s973_s9 = smov %s694_s10 }
  0x5c   : > { %s974_s10 = smov %s698_s11  ;;  %s975_s11 = smov %s760_s18 }
  0x5d   : > { %s976_s12 = smov %s748_s15  ;;  %17 = sbr.rel (!%p15_p2) target bundleno = 5 (0x5), region = 76 }
  0x62   :  { %446 = vsyncpa [#allocation3], 1 }
  0x63   :  { %448 = vsyncpa [#allocation3 + $0x1], 1 }
  0x64   :  { %449 = vsyncpa [#allocation4], 1 }
  0x65   :  { %451 = vsyncpa [#allocation4 + $0x1], 1 }

</bundles_post_ra>
